<compile_context>
chip_gen: v7x
topology: tpu7x:2x2x1
jax: 0.10.0
libtpu: 0.0.40
codegen_flags: <defaults>
</compile_context>

<pallas_src>
import jax
import jax.numpy as jnp
from jax.experimental import pallas as pl
from jax.experimental.pallas import tpu as pltpu


def _make_head_kernel(final_layer_on_vpu: bool, matmul_dtype):
    def head_kernel(x_ref, w1_ref, b1_ref, w2_ref, b2_ref, w3_ref, b3_ref, o_ref):
        # Fused 3-layer MLP + sigmoid; everything for one batch tile lives in VMEM.
        x = x_ref[...]

        # Layer 1: [tm, 256] @ [256, 128] on the MXU, f32 accumulation.
        h1 = jnp.dot(x, w1_ref[...], preferred_element_type=jnp.float32) + b1_ref[...]
        h1 = jnp.maximum(h1, 0.0)          # ReLU (Dropout(0.3) = identity in eval)

        # Layer 2: [tm, 128] @ [128, 64] on the MXU (operands in matmul_dtype).
        h2 = jnp.dot(h1.astype(matmul_dtype), w2_ref[...],
                     preferred_element_type=jnp.float32) + b2_ref[...]
        h2 = jnp.maximum(h2, 0.0)          # ReLU (Dropout(0.2) = identity in eval)

        if final_layer_on_vpu:
            # num_classes == 1: [tm,64] @ [64,1] is a degenerate matmul (one
            # useful MXU output lane).  Do it as a VPU broadcast-multiply plus
            # XLU lane reduction instead; w3_ref here is the transposed weight
            # row of shape (1, 64), kept in f32 (v5e-safe).
            logits = jnp.sum(h2 * w3_ref[...], axis=-1, keepdims=True) + b3_ref[...]
        else:
            logits = (jnp.dot(h2.astype(w3_ref.dtype), w3_ref[...],
                              preferred_element_type=jnp.float32) + b3_ref[...])

        o_ref[...] = jax.nn.sigmoid(logits).astype(o_ref.dtype)

    return head_kernel


def _round_up(n: int, m: int) -> int:
    return ((n + m - 1) // m) * m


def _tpu_tile_defaults():
    """(default batch tile, is_dual_tensorcore) per TPU generation."""
    try:
        kind = jax.devices()[0].device_kind.lower()
    except Exception:  # device probing only; never affects numerics
        kind = ""
    if "v7" in kind:
        return 8192, True     # bf16 x tile 4 MiB x3 + f32 h1/h2 ~ 19 MiB < 32 MiB scoped
    if "v6" in kind:
        return 4096, False    # ~10 MiB, well under the 32 MiB scoped default
    return 2048, False        # v5e / unknown: ~6 MiB, under the 16 MiB scoped default


def head_forward(x, params, *, block_b=None, matmul_dtype=jnp.bfloat16):
    """Fused Head forward. x: [B, in_features]; params: w1,b1,w2,b2,w3,b3 (f32)."""
    B, F_in = x.shape
    w1, b1 = params["w1"], params["b1"]
    w2, b2 = params["w2"], params["b2"]
    w3, b3 = params["w3"], params["b3"]
    H1, H2, C = w1.shape[1], w2.shape[1], w3.shape[1]

    tile_default, dual_tc = _tpu_tile_defaults()
    if block_b is None:
        block_b = min(tile_default, _round_up(B, 8))
        # v7x: keep at least 2 grid steps so both TensorCores get work.
        if dual_tc and B > 8 and pl.cdiv(B, block_b) < 2:
            block_b = _round_up(pl.cdiv(B, 2), 8)

    final_on_vpu = (C == 1)

    # Operand dtypes: matmul inputs in matmul_dtype (bf16 by default), all
    # VPU-side operands (biases, VPU final layer) in f32.
    x_in = x if x.dtype == matmul_dtype else x.astype(matmul_dtype)
    w1_in = w1.astype(matmul_dtype)
    b1_in = b1.astype(jnp.float32)
    w2_in = w2.astype(matmul_dtype)
    b2_in = b2.astype(jnp.float32)
    w3_in = w3.T.astype(jnp.float32) if final_on_vpu else w3.astype(matmul_dtype)
    b3_in = b3.astype(jnp.float32)

    # Padding-free ragged batch: Pallas masks the partial last block itself.
    grid = (pl.cdiv(B, block_b),)
    out_dtype = jnp.float32

    itemsize = jnp.dtype(matmul_dtype).itemsize
    flops = 2 * B * (F_in * H1 + H1 * H2 + H2 * C)
    bytes_accessed = (x_in.size * itemsize
                      + w1_in.size * itemsize + w2_in.size * itemsize
                      + w3_in.size * jnp.dtype(w3_in.dtype).itemsize
                      + 4 * (b1_in.size + b2_in.size + b3_in.size)
                      + 4 * B * C)
    cost = pl.CostEstimate(flops=flops, transcendentals=B * C,
                           bytes_accessed=bytes_accessed)

    def build(use_pipeline_modes: bool):
        def const_spec(shape):
            # Weights/biases: identical block at every grid step; single-buffer
            # them so they don't burn a redundant double-buffer copy in VMEM.
            kwargs = ({"pipeline_mode": pl.Buffered(1)}
                      if use_pipeline_modes else {})
            return pl.BlockSpec(shape, lambda i: (0,) * len(shape), **kwargs)

        # x tile: triple-buffer to hide DMA issue latency behind the short
        # per-tile compute.
        x_kwargs = ({"pipeline_mode": pl.Buffered(3)}
                    if use_pipeline_modes else {})

        return pl.pallas_call(
            _make_head_kernel(final_on_vpu, matmul_dtype),
            out_shape=jax.ShapeDtypeStruct((B, C), out_dtype),
            grid=grid,
            in_specs=[
                pl.BlockSpec((block_b, F_in), lambda i: (i, 0), **x_kwargs),
                const_spec(w1_in.shape),
                const_spec(b1_in.shape),
                const_spec(w2_in.shape),
                const_spec(b2_in.shape),
                const_spec(w3_in.shape),
                const_spec(b3_in.shape),
            ],
            out_specs=pl.BlockSpec((block_b, C), lambda i: (i, 0)),
            compiler_params=pltpu.CompilerParams(
                dimension_semantics=("parallel",)),
            cost_estimate=cost,
        )

    args = (x_in, w1_in, b1_in, w2_in, b2_in, w3_in, b3_in)
    try:
        return build(use_pipeline_modes=True)(*args)
    except (TypeError, NotImplementedError, pltpu.LoweringException):
        # Narrow fallback: only for jax builds that reject pipeline_mode on a
        # top-level BlockSpec.  Real compile failures (VMEM OOM, etc.) still
        # propagate.
        return build(use_pipeline_modes=False)(*args)


def init_params(key, in_features=256, hidden_dim=128, num_classes=1):
    """Deterministic synthetic params (PyTorch-like uniform fan-in init)."""
    dims = [(in_features, hidden_dim),
            (hidden_dim, hidden_dim // 2),
            (hidden_dim // 2, num_classes)]
    params = {}
    for idx, (fan_in, fan_out) in enumerate(dims, start=1):
        key, kw, kb = jax.random.split(key, 3)
        bound = 1.0 / jnp.sqrt(jnp.float32(fan_in))
        params[f"w{idx}"] = jax.random.uniform(
            kw, (fan_in, fan_out), jnp.float32, minval=-bound, maxval=bound)
        params[f"b{idx}"] = jax.random.uniform(
            kb, (1, fan_out), jnp.float32, minval=-bound, maxval=bound)
    return params


def head_reference(x, params):
    h1 = jnp.maximum(x @ params["w1"] + params["b1"], 0.0)
    h2 = jnp.maximum(h1 @ params["w2"] + params["b2"], 0.0)
    return jax.nn.sigmoid(h2 @ params["w3"] + params["b3"])


if __name__ == "__main__":
    key = jax.random.PRNGKey(0)
    key, kx1, kx2 = jax.random.split(key, 3)

    F_in, H, C = 256, 128, 1
    params = init_params(key, in_features=F_in, hidden_dim=H, num_classes=C)

    # Small aligned batch, f32 matmul path: tight tolerance vs f32 reference.
    B1 = 8
    x1 = jax.random.normal(kx1, (B1, F_in), jnp.float32)
    out1 = jax.block_until_ready(
        head_forward(x1, params, matmul_dtype=jnp.float32))
    ref1 = head_reference(x1, params)
    assert out1.shape == (B1, C), out1.shape
    assert jnp.allclose(out1, ref1, atol=1e-5, rtol=1e-5), \
        "mismatch vs reference (aligned, f32)"

    # Ragged batch + multi-step grid + partial last tile, default bf16
    # streaming path: looser tolerance vs the f32 reference.
    B2 = 50
    x2 = jax.random.normal(kx2, (B2, F_in), jnp.float32)
    out2 = jax.block_until_ready(head_forward(x2, params, block_b=16))
    ref2 = head_reference(x2, params)
    assert out2.shape == (B2, C), out2.shape
    assert jnp.allclose(out2, ref2, atol=2e-2, rtol=2e-2), \
        "mismatch vs reference (ragged, bf16)"

    print("KERNEL_OK")
</pallas_src>

<mosaic_0001>
module attributes {stable_mosaic.version = 11 : i64} {
  func.func @head_kernel(%arg0: i32, %arg1: memref<8x256xf32, #tpu.memory_space<vmem>>, %arg2: memref<256x128xf32, #tpu.memory_space<vmem>>, %arg3: memref<1x128xf32, #tpu.memory_space<vmem>>, %arg4: memref<128x64xf32, #tpu.memory_space<vmem>>, %arg5: memref<1x64xf32, #tpu.memory_space<vmem>>, %arg6: memref<1x64xf32, #tpu.memory_space<vmem>>, %arg7: memref<1x1xf32, #tpu.memory_space<vmem>>, %arg8: memref<8x1xf32, #tpu.memory_space<vmem>>) attributes {dimension_semantics = [#tpu.dimension_semantics<parallel>], iteration_bounds = array<i64: 1>, scalar_prefetch = 0 : i64, scratch_operands = 0 : i64, tpu.core_type = #tpu.core_type<tc>, window_params = [{transform_indices = @transform_0, window_bounds = array<i64: 8, 256>}, {pipeline_mode = #tpu.pipeline_mode<synchronous>, transform_indices = @transform_1, window_bounds = array<i64: 256, 128>}, {pipeline_mode = #tpu.pipeline_mode<synchronous>, transform_indices = @transform_2, window_bounds = array<i64: 1, 128>}, {pipeline_mode = #tpu.pipeline_mode<synchronous>, transform_indices = @transform_3, window_bounds = array<i64: 128, 64>}, {pipeline_mode = #tpu.pipeline_mode<synchronous>, transform_indices = @transform_4, window_bounds = array<i64: 1, 64>}, {pipeline_mode = #tpu.pipeline_mode<synchronous>, transform_indices = @transform_5, window_bounds = array<i64: 1, 64>}, {pipeline_mode = #tpu.pipeline_mode<synchronous>, transform_indices = @transform_6, window_bounds = array<i64: 1, 1>}, {transform_indices = @transform_7, window_bounds = array<i64: 8, 1>}]} {
    %c0 = arith.constant 0 : index
    %c0_0 = arith.constant 0 : index
    %0 = vector.load %arg1[%c0, %c0_0] : memref<8x256xf32, #tpu.memory_space<vmem>>, vector<8x256xf32>
    %c0_1 = arith.constant 0 : index
    %c0_2 = arith.constant 0 : index
    %1 = vector.load %arg2[%c0_1, %c0_2] : memref<256x128xf32, #tpu.memory_space<vmem>>, vector<256x128xf32>
    %cst = arith.constant dense<0.000000e+00> : vector<8x128xf32>
    %2 = tpu.matmul %0, %1, %cst {dimension_numbers = #tpu.dot_dimension_numbers<[1], [0], [0], [1], [0, 0, 1, 1], [], []>} : vector<8x256xf32>, vector<256x128xf32>, vector<8x128xf32> -> vector<8x128xf32>
    %c0_3 = arith.constant 0 : index
    %c0_4 = arith.constant 0 : index
    %3 = vector.load %arg3[%c0_3, %c0_4] : memref<1x128xf32, #tpu.memory_space<vmem>>, vector<1x128xf32>
    %4 = vector.broadcast %3 : vector<1x128xf32> to vector<8x128xf32>
    %5 = arith.addf %2, %4 : vector<8x128xf32>
    %cst_5 = arith.constant 0.000000e+00 : f32
    %6 = vector.broadcast %cst_5 : f32 to vector<8x128xf32>
    %7 = arith.maximumf %5, %6 : vector<8x128xf32>
    %c0_6 = arith.constant 0 : index
    %c0_7 = arith.constant 0 : index
    %8 = vector.load %arg4[%c0_6, %c0_7] : memref<128x64xf32, #tpu.memory_space<vmem>>, vector<128x64xf32>
    %cst_8 = arith.constant dense<0.000000e+00> : vector<8x64xf32>
    %9 = tpu.matmul %7, %8, %cst_8 {dimension_numbers = #tpu.dot_dimension_numbers<[1], [0], [0], [1], [0, 0, 1, 1], [], []>} : vector<8x128xf32>, vector<128x64xf32>, vector<8x64xf32> -> vector<8x64xf32>
    %c0_9 = arith.constant 0 : index
    %c0_10 = arith.constant 0 : index
    %10 = vector.load %arg5[%c0_9, %c0_10] : memref<1x64xf32, #tpu.memory_space<vmem>>, vector<1x64xf32>
    %11 = vector.broadcast %10 : vector<1x64xf32> to vector<8x64xf32>
    %12 = arith.addf %9, %11 : vector<8x64xf32>
    %cst_11 = arith.constant 0.000000e+00 : f32
    %13 = vector.broadcast %cst_11 : f32 to vector<8x64xf32>
    %14 = arith.maximumf %12, %13 : vector<8x64xf32>
    %c0_12 = arith.constant 0 : index
    %c0_13 = arith.constant 0 : index
    %15 = vector.load %arg6[%c0_12, %c0_13] : memref<1x64xf32, #tpu.memory_space<vmem>>, vector<1x64xf32>
    %16 = vector.broadcast %15 : vector<1x64xf32> to vector<8x64xf32>
    %17 = arith.mulf %14, %16 : vector<8x64xf32>
    %cst_14 = arith.constant dense<0.000000e+00> : vector<8xf32>
    %18 = vector.multi_reduction <add>, %17, %cst_14 [1] : vector<8x64xf32> to vector<8xf32>
    %19 = vector.shape_cast %18 : vector<8xf32> to vector<8x1xf32>
    %c0_15 = arith.constant 0 : index
    %c0_16 = arith.constant 0 : index
    %20 = vector.load %arg7[%c0_15, %c0_16] : memref<1x1xf32, #tpu.memory_space<vmem>>, vector<1x1xf32>
    %21 = vector.broadcast %20 : vector<1x1xf32> to vector<8x1xf32>
    %22 = arith.addf %19, %21 : vector<8x1xf32>
    %23 = arith.negf %22 : vector<8x1xf32>
    %24 = math.exp %23 : vector<8x1xf32>
    %cst_17 = arith.constant 1.000000e+00 : f32
    %25 = vector.broadcast %cst_17 : f32 to vector<8x1xf32>
    %26 = arith.addf %25, %24 : vector<8x1xf32>
    %27 = arith.divf %25, %26 : vector<8x1xf32>
    %c0_18 = arith.constant 0 : index
    %c0_19 = arith.constant 0 : index
    %28 = vector.load %arg8[%c0_18, %c0_19] : memref<8x1xf32, #tpu.memory_space<vmem>>, vector<8x1xf32>
    tpu.vector_store %arg8[%c0_18, %c0_19], %27 {strides = array<i32>} : memref<8x1xf32, #tpu.memory_space<vmem>>, vector<8x1xf32>,
    return
  }
  func.func @transform_0(%arg0: i32) -> (i32, i32) {
    %c0_i32 = arith.constant 0 : i32
    %c0_i32_0 = arith.constant 0 : i32
    return %arg0, %c0_i32 : i32, i32
  }
  func.func @transform_1(%arg0: i32) -> (i32, i32) {
    %c0_i32 = arith.constant 0 : i32
    %c0_i32_0 = arith.constant 0 : i32
    %c0_i32_1 = arith.constant 0 : i32
    return %c0_i32, %c0_i32_0 : i32, i32
  }
  func.func @transform_2(%arg0: i32) -> (i32, i32) {
    %c0_i32 = arith.constant 0 : i32
    %c0_i32_0 = arith.constant 0 : i32
    %c0_i32_1 = arith.constant 0 : i32
    return %c0_i32, %c0_i32_0 : i32, i32
  }
  func.func @transform_3(%arg0: i32) -> (i32, i32) {
    %c0_i32 = arith.constant 0 : i32
    %c0_i32_0 = arith.constant 0 : i32
    %c0_i32_1 = arith.constant 0 : i32
    return %c0_i32, %c0_i32_0 : i32, i32
  }
  func.func @transform_4(%arg0: i32) -> (i32, i32) {
    %c0_i32 = arith.constant 0 : i32
    %c0_i32_0 = arith.constant 0 : i32
    %c0_i32_1 = arith.constant 0 : i32
    return %c0_i32, %c0_i32_0 : i32, i32
  }
  func.func @transform_5(%arg0: i32) -> (i32, i32) {
    %c0_i32 = arith.constant 0 : i32
    %c0_i32_0 = arith.constant 0 : i32
    %c0_i32_1 = arith.constant 0 : i32
    return %c0_i32, %c0_i32_0 : i32, i32
  }
  func.func @transform_6(%arg0: i32) -> (i32, i32) {
    %c0_i32 = arith.constant 0 : i32
    %c0_i32_0 = arith.constant 0 : i32
    %c0_i32_1 = arith.constant 0 : i32
    return %c0_i32, %c0_i32_0 : i32, i32
  }
  func.func @transform_7(%arg0: i32) -> (i32, i32) {
    %c0_i32 = arith.constant 0 : i32
    %c0_i32_0 = arith.constant 0 : i32
    return %arg0, %c0_i32 : i32, i32
  }
}

</mosaic_0001>

<bundles_post_ra>
// kernel: tpu_custom_call.1
= control target key start
LH: loop header
LB: loop body
LE: loop exit
PB: predicated region body
PF: predicated region fallthrough
CT: control target
= control target key end

     0   :  { %s598_s0 = inlined_call_operand.vmem [shape: f32[8,256], index: 0, kind: input, shape index: {}]   ;;  %s599_s1 = inlined_call_operand.hbm [shape: f32[256,128], index: 1, kind: input, shape index: {}]   ;;  %s600_s2 = inlined_call_operand.vmem [shape: f32[1,128], index: 2, kind: input, shape index: {}]   ;;  %s601_s3 = inlined_call_operand.vmem [shape: f32[128,64], index: 3, kind: input, shape index: {}]   ;;  %s602_s4 = inlined_call_operand.vmem [shape: f32[1,64], index: 4, kind: input, shape index: {}]   ;;  %s603_s5 = inlined_call_operand.vmem [shape: f32[1,64], index: 5, kind: input, shape index: {}]   ;;  %s604_s6 = inlined_call_operand.<no memory space> [shape: f32[1,1], index: 6, kind: input, shape index: {}]   ;;  %s605_s7 = inlined_call_operand.vmem [shape: f32[8,1], index: 7, kind: output, shape index: {}]  }
   0x1   :  { %v12_v0 = vstv %s604_s6 }
   0x2   :  { %13 = vst [vmem:[#allocation2] sm:$0x1] %v12_v0 }
   0x3   :  { %14 = vsyncpa [#allocation4], 0  ;;  %s463_s26 = smov [#allocation3]   ;;  %s439_s30 = scalar_lea.hbm %s599_s1, 4096 }
   0x4   :  { %s22_s27 = sshll.u32 %s463_s26, 4  ;;  %p440_p0 = scmp.ne.s32.totalorder %s599_s1, %s439_s30  ;;  %s23_s27 = int_to_ptr.vmem [resolvable:$true] %s22_s27 }
   0x5   :  { %p443_p1 = scmp.lt.u32.totalorder %s439_s30, %s599_s1 }
   0x7   :  { %p445_p2 = pnand %p443_p1, %p440_p0 }
   0x9   :  { %448 = shalt.err (!%p445_p2)
}
   0xa   :  { %s449_s6 = scalar_lea.vmem %s23_s27, 4096  ;;  %p454_p4 = scmp.lt.s32.totalorder %s23_s27, %s23_s27 }
   0xb   :  { %p450_p3 = scmp.ne.s32.totalorder %s23_s27, %s449_s6  ;;  %p455_p5 = scmp.lt.s32.totalorder %s449_s6, %s449_s6 }
   0xd   :  { %p456_p6 = por %p455_p5, %p454_p4 }
   0xf   :  { %p457_p7 = pnand %p456_p6, %p450_p3 }
  0x11   :  { %460 = shalt.err (!%p457_p7)
}
  0x12   :  { %s464_s12 = smov 128   ;;  %s465_s13 = smov 8  }
  0x13   :  { %28 = dma.hbm_to_vmem [thread:$0]  %s599_s1, 4096, %s23_s27, [#allocation4], %s464_s12, %s464_s12, %s465_s13  }
  0x14   :  { %461 = dma.done.wait [#allocation4], 4096  }
  0x15   :  { %462 = vsyncadd [#allocation4], 4294963200  ;;  %v466_v1 = vmov 0.0|0.0   ;;  %v60_v2 = vld [vmem:[#allocation3 + $0x80] sm:$0xff]  ;;  %v61_v3 = vld [vmem:[#allocation3 + $0x88] sm:$0xff]  ;;  %vm467_vm0 = vmmov 0  }
  0x16   :  { %405 = vmatprep.subr.bf16.mxu1 %v466_v1  ;;  %v44_v4 = vld [vmem:[#allocation3] sm:$0xff]  ;;  %v373_v5 = vpack.c.bf16 %v61_v3, %v60_v2  ;;  %v45_v6 = vld [vmem:[#allocation3 + $0x8] sm:$0xff]  ;;  %v62_v7 = vld [vmem:[#allocation3 + $0x90] sm:$0xff]  ;;  %vm256_vm1 = vcmask 523264   ;;  %vm274_vm2 = vcmask 7168  }
  0x17   :  { %v63_v8 = vld [vmem:[#allocation3 + $0x98] sm:$0xff]  ;;  %v375_v9 = vpack.c.bf16 %v45_v6, %v44_v4  ;;  %v46_v11 = vld [vmem:[#allocation3 + $0x10] sm:$0xff]  ;;  %v64_v13 = vld [vmem:[#allocation3 + $0xa0] sm:$0xff] }
  0x18   :  { %v377_v10 = vpack.c.bf16 %v63_v8, %v62_v7  ;;  %v47_v12 = vld [vmem:[#allocation3 + $0x18] sm:$0xff]  ;;  %374 = vmatprep.subr.bf16.mxu0 %v373_v5  ;;  %v65_v14 = vld [vmem:[#allocation3 + $0xa8] sm:$0xff]  ;;  %v48_v17 = vld [vmem:[#allocation3 + $0x20] sm:$0xff] }
  0x19   :  { %376 = vmatpush3.bf16.msra.mxu0 %v375_v9  ;;  %v379_v15 = vpack.c.bf16 %v47_v12, %v46_v11  ;;  %v381_v16 = vpack.c.bf16 %v65_v14, %v64_v13  ;;  %v49_v18 = vld [vmem:[#allocation3 + $0x28] sm:$0xff]  ;;  %v66_v19 = vld [vmem:[#allocation3 + $0xb0] sm:$0xff]  ;;  %v67_v20 = vld [vmem:[#allocation3 + $0xb8] sm:$0xff]  ;;  %v468_v13 = vmov 0.0  }
  0x1a   :  { %378 = vmatprep.subr.bf16.mxu0 %v377_v10  ;;  %v383_v21 = vpack.c.bf16 %v49_v18, %v48_v17  ;;  %v385_v22 = vpack.c.bf16 %v67_v20, %v66_v19  ;;  %v50_v23 = vld [vmem:[#allocation3 + $0x30] sm:$0xff]  ;;  %v51_v24 = vld [vmem:[#allocation3 + $0x38] sm:$0xff]  ;;  %v68_v25 = vld [vmem:[#allocation3 + $0xc0] sm:$0xff]  ;;  %370 = vmatprep.mubr.msk.f32.mxu1 %vm467_vm0, %v468_v13 }
  0x1b   :  { %v69_v26 = vld [vmem:[#allocation3 + $0xc8] sm:$0xff]  ;;  %v154_v28 = vld [vmem:[%s601_s3] sm:$0xff]  ;;  %v387_v30 = vpack.c.bf16 %v51_v24, %v50_v23  ;;  %v157_v33 = vld [vmem:[%s601_s3 + $0x18] sm:$0xff] }
  0x1c   :  { %v43_v27 = vld [vmem:[%s598_s0 + $0x8] sm:$0xff]  ;;  %v156_v32 = vld [vmem:[%s601_s3 + $0x10] sm:$0xff]  ;;  %v389_v34 = vpack.c.bf16 %v69_v26, %v68_v25  ;;  %v71_v38 = vld [vmem:[#allocation3 + $0xd8] sm:$0xff] }
  0x1d   :  { %380 = vmatpush3.bf16.msra.mxu0 %v379_v15  ;;  %147 = vmatprep.mubr.f32.mxu0 %v43_v27  ;;  %v155_v29 = vld [vmem:[%s601_s3 + $0x8] sm:$0xff]  ;;  %v70_v37 = vld [vmem:[#allocation3 + $0xd0] sm:$0xff]  ;;  %v409_v39 = vpack.c.bf16 %v157_v33, %v156_v32  ;;  %v158_v40 = vld [vmem:[%s601_s3 + $0x20] sm:$0xff] }
  0x1e   :  { %382 = vmatprep.subr.bf16.mxu0 %v381_v16  ;;  %v406_v31 = vpack.c.bf16 %v155_v29, %v154_v28  ;;  %v52_v35 = vld [vmem:[#allocation3 + $0x40] sm:$0xff]  ;;  %v53_v36 = vld [vmem:[#allocation3 + $0x48] sm:$0xff]  ;;  %v393_v43 = vpack.c.bf16 %v71_v38, %v70_v37  ;;  %v54_v44 = vld [vmem:[#allocation3 + $0x50] sm:$0xff] }
  0x1f   :  { %v159_v41 = vld [vmem:[%s601_s3 + $0x28] sm:$0xff]  ;;  %v391_v42 = vpack.c.bf16 %v53_v36, %v52_v35  ;;  %v55_v45 = vld [vmem:[#allocation3 + $0x58] sm:$0xff]  ;;  %v160_v49 = vld [vmem:[%s601_s3 + $0x30] sm:$0xff] }
  0x20   :  { %407 = vmatpush3.bf16.msra.mxu1 %v406_v31  ;;  %v72_v46 = vld [vmem:[#allocation3 + $0xe0] sm:$0xff]  ;;  %v73_v47 = vld [vmem:[#allocation3 + $0xe8] sm:$0xff]  ;;  %v412_v48 = vpack.c.bf16 %v159_v41, %v158_v40  ;;  %v161_v50 = vld [vmem:[%s601_s3 + $0x38] sm:$0xff]  ;;  %v395_v51 = vpack.c.bf16 %v55_v45, %v54_v44 }
  0x21   :  { %384 = vmatpush3.bf16.msra.mxu0 %v383_v21  ;;  %408 = vmatprep.subr.bf16.mxu1 %v466_v1  ;;  %v397_v52 = vpack.c.bf16 %v73_v47, %v72_v46  ;;  %v56_v53 = vld [vmem:[#allocation3 + $0x60] sm:$0xff]  ;;  %v57_v54 = vld [vmem:[#allocation3 + $0x68] sm:$0xff]  ;;  %v74_v55 = vld [vmem:[#allocation3 + $0xf0] sm:$0xff]  ;;  %v415_v57 = vpack.c.bf16 %v161_v50, %v160_v49 }
  0x22   :  { %386 = vmatprep.subr.bf16.mxu0 %v385_v22  ;;  %v75_v56 = vld [vmem:[#allocation3 + $0xf8] sm:$0xff]  ;;  %v163_v59 = vld [vmem:[%s601_s3 + $0x48] sm:$0xff]  ;;  %v399_v60 = vpack.c.bf16 %v57_v54, %v56_v53  ;;  %v58_v62 = vld [vmem:[#allocation3 + $0x70] sm:$0xff] }
  0x23   :  { %v162_v58 = vld [vmem:[%s601_s3 + $0x40] sm:$0xff]  ;;  %v401_v61 = vpack.c.bf16 %v75_v56, %v74_v55  ;;  %v164_v2 = vld [vmem:[%s601_s3 + $0x50] sm:$0xff]  ;;  %v165_v3 = vld [vmem:[%s601_s3 + $0x58] sm:$0xff] }
  0x24   :  { %410 = vmatpush3.bf16.msra.mxu1 %v409_v39  ;;  %v59_v63 = vld [vmem:[#allocation3 + $0x78] sm:$0xff]  ;;  %v418_v0 = vpack.c.bf16 %v163_v59, %v162_v58  ;;  %v421_v5 = vpack.c.bf16 %v165_v3, %v164_v2  ;;  %v167_v8 = vld [vmem:[%s601_s3 + $0x68] sm:$0xff]  ;;  %v168_v10 = vld [vmem:[%s601_s3 + $0x70] sm:$0xff] }
  0x25   :  { %388 = vmatpush3.bf16.msra.mxu0 %v387_v30  ;;  %411 = vmatprep.subr.bf16.mxu1 %v466_v1  ;;  %v403_v4 = vpack.c.bf16 %v59_v63, %v58_v62  ;;  %v42_v6 = vld [vmem:[%s598_s0] sm:$0xff]  ;;  %v169_v11 = vld [vmem:[%s601_s3 + $0x78] sm:$0xff] }
  0x26   :  { %390 = vmatprep.subr.bf16.mxu0 %v389_v34  ;;  %v166_v7 = vld [vmem:[%s601_s3 + $0x60] sm:$0xff]  ;;  %v427_v12 = vpack.c.bf16 %v169_v11, %v168_v10 }
  0x27   :  { %v424_v9 = vpack.c.bf16 %v167_v8, %v166_v7  ;;  %v281_v15 = vld [vmem:[%s600_s2] ss:$0 sm:$0xff] }
  0x28   :  { %413 = vmatpush3.bf16.msra.mxu1 %v412_v48  ;;  %v282_v19 = vld [vmem:[%s602_s4] ss:$0 sm:$0xff] }
  0x29   :  { %392 = vmatpush3.bf16.msra.mxu0 %v391_v42  ;;  %414 = vmatprep.subr.bf16.mxu1 %v466_v1  ;;  %v283_v23 = vld [vmem:[%s603_s5] ss:$0 sm:$0xff] }
  0x2a   :  { %394 = vmatprep.subr.bf16.mxu0 %v393_v43  ;;  %v284_v27 = vld [vmem:[#allocation2] ss:$0 sm:$0xff] }
  0x2c   :  { %416 = vmatpush3.bf16.msra.mxu1 %v415_v57 }
  0x2d   :  { %396 = vmatpush3.bf16.msra.mxu0 %v395_v51  ;;  %417 = vmatprep.subr.bf16.mxu1 %v466_v1 }
  0x2e   :  { %398 = vmatprep.subr.bf16.mxu0 %v397_v52 }
  0x30   :  { %419 = vmatpush3.bf16.msra.mxu1 %v418_v0 }
  0x31   :  { %400 = vmatpush3.bf16.msra.mxu0 %v399_v60  ;;  %420 = vmatprep.subr.bf16.mxu1 %v466_v1 }
  0x32   :  { %402 = vmatprep.subr.bf16.mxu0 %v401_v61 }
  0x34   :  { %422 = vmatpush3.bf16.msra.mxu1 %v421_v5 }
  0x35   :  { %404 = vmatpush3.bf16.msra.mxu0 %v403_v4  ;;  %423 = vmatprep.subr.bf16.mxu1 %v466_v1 }
  0x38   :  { %148 = vmatmul.mubr.f32.vlgmr.msra.gmra.mrb[0].mxu0 %v42_v6  ;;  %425 = vmatpush3.bf16.msra.mxu1 %v424_v9 }
  0x39   :  { %426 = vmatprep.subr.bf16.mxu1 %v466_v1 }
  0x3c   :  { %428 = vmatpush3.bf16.msra.mxu1 %v427_v12 }
 0x10b   :  { %v318_v14 = vpop.f32.mrb[0].mxu0 }
 0x10c   :  { %v319_v16 = vpop.f32.mrb[1].mxu0 }
 0x10d   :  { %v320_v1 = vadd.f32 %v319_v16, %v318_v14 }
 0x10f   :  { %v150_v17 = vadd.f32 %v320_v1, %v281_v15 }
 0x111   :  { %v153_v18 = vmax.f32 %v150_v17, 0.0 }
 0x113   :  { %371 = vmatmul.mubr.f32.vlgmr.msra.gmra.mrb[0].mxu1 %v153_v18 }
 0x1e6   :  { %v243_v20 = vpop.f32.mrb[0].mxu1 }
 0x1e7   :  { %v244_v21 = vadd.f32 %v282_v19, %v243_v20  ;;  %v372_v22 = vpop.f32.mrb[1].mxu1 }
 0x1e9   :  { %v247_v24 = vmax.f32 %v244_v21, 0.0 }
 0x1eb   :  { %v255_v25 = vmul.f32 %v283_v23, %v247_v24 }
 0x1ed   :  { %v257_v26 = vsel %vm256_vm1, %v255_v25, 0.0 }
 0x1ee   :  { %258 = vadd.xlane.f32.xlu0 %v257_v26 }
 0x27b   :  { %v259_v28 = vpop.xlane.xlu0 %258 }
 0x27c   :  { %v267_v29 = vadd.f32 %v284_v27, %v259_v28 }
 0x27e   :  { %v285_v30 = vmul.f32 -1.442695, %v267_v29 }
 0x280   :  { %435 = vpow2.f32 %v285_v30 }
 0x28a   :  { %v436_v31 = vpop.eup %435 }
 0x28b   :  { %v271_v32 = vadd.f32 1.0, %v436_v31 }
 0x28d   :  { %437 = vrcp.f32 %v271_v32 }
 0x297   :  { %v438_v33 = vpop.eup %437 }
 0x298   :  { %275 = vst.msk [vmem:[%s605_s7] sm:$0xff] %vm274_vm2, %v438_v33 }
 0x299   :  { %280 = vsyncpa [#allocation4], 1 }

</bundles_post_ra>
